<compile_context>
chip_gen: v6e
topology: v6e:2x2x1
jax: 0.10.0
libtpu: 0.0.40
codegen_flags: <defaults>
</compile_context>

<pallas_src>
import jax
import jax.numpy as jnp
from jax.experimental import pallas as pl
from jax.experimental.pallas import tpu as pltpu

_LANE = 1024       # lane-dense last dim (multiple of 128)
_ROW_BLOCK = 512   # rows per grid step: 512*1024*4 B = 2 MiB per f32 block


def _h_sigmoid_kernel(x_ref, o_ref):
    x = x_ref[...]
    three = jnp.asarray(3, x.dtype)
    zero = jnp.asarray(0, x.dtype)
    six = jnp.asarray(6, x.dtype)
    # relu6(x + 3) / 6
    o_ref[...] = (jnp.clip(x + three, zero, six) / six).astype(o_ref.dtype)


def h_sigmoid(x):
    """Elementwise hard-sigmoid on an arbitrarily-shaped array (e.g. NCHW)."""
    orig_shape = x.shape
    orig_dtype = x.dtype
    total = x.size

    # Lane-dense flattening: fold everything into (rows, _LANE), padding the
    # tail if the element count is not a multiple of _LANE.
    lane = _LANE
    flat = x.reshape(-1)
    padded_total = ((total + lane - 1) // lane) * lane
    if padded_total != total:
        flat = jnp.pad(flat, (0, padded_total - total))
    rows = padded_total // lane
    x2 = flat.reshape(rows, lane)

    # Row block: full extent when small (block == array dim is always legal),
    # otherwise a multiple-of-8 tile sized for all TPU generations.
    br = rows if rows < _ROW_BLOCK else _ROW_BLOCK
    grid = (pl.cdiv(rows, br),)

    elem_bytes = jnp.dtype(orig_dtype).itemsize
    cost = pl.CostEstimate(
        flops=3 * padded_total,
        transcendentals=0,
        bytes_accessed=2 * padded_total * elem_bytes,
    )

    out2 = pl.pallas_call(
        _h_sigmoid_kernel,
        out_shape=jax.ShapeDtypeStruct((rows, lane), orig_dtype),
        grid=grid,
        in_specs=[pl.BlockSpec((br, lane), lambda i: (i, 0))],
        out_specs=pl.BlockSpec((br, lane), lambda i: (i, 0)),
        compiler_params=pltpu.CompilerParams(
            dimension_semantics=("parallel",)),
        cost_estimate=cost,
    )(x2)

    out_flat = out2.reshape(-1)
    if padded_total != total:
        out_flat = out_flat[:total]
    return out_flat.reshape(orig_shape)


if __name__ == "__main__":
    key = jax.random.PRNGKey(0)
    # NCHW input, consistent with the PyTorch module's typical usage.
    x = jax.random.normal(key, (2, 4, 16, 16), dtype=jnp.float32) * 4.0

    y = h_sigmoid(x)
    y = jax.block_until_ready(y)

    # Reference check in plain JAX (same formula as torch: relu6(x+3)/6).
    y_ref = jnp.clip(x + 3.0, 0.0, 6.0) / 6.0
    assert y.shape == x.shape
    assert jnp.allclose(y, y_ref, atol=1e-6), "mismatch vs reference"

    print("KERNEL_OK")
</pallas_src>

<mosaic_0001>
module attributes {stable_mosaic.version = 11 : i64} {
  func.func @_h_sigmoid_kernel(%arg0: i32, %arg1: memref<2x1024xf32, #tpu.memory_space<vmem>>, %arg2: memref<2x1024xf32, #tpu.memory_space<vmem>>) attributes {dimension_semantics = [#tpu.dimension_semantics<parallel>], iteration_bounds = array<i64: 1>, scalar_prefetch = 0 : i64, scratch_operands = 0 : i64, tpu.core_type = #tpu.core_type<tc>, window_params = [{transform_indices = @transform_0, window_bounds = array<i64: 2, 1024>}, {transform_indices = @transform_1, window_bounds = array<i64: 2, 1024>}]} {
    %c0 = arith.constant 0 : index
    %c0_0 = arith.constant 0 : index
    %0 = vector.load %arg1[%c0, %c0_0] : memref<2x1024xf32, #tpu.memory_space<vmem>>, vector<2x1024xf32>
    %cst = arith.constant 3.000000e+00 : f32
    %1 = vector.broadcast %cst : f32 to vector<2x1024xf32>
    %2 = arith.addf %0, %1 : vector<2x1024xf32>
    %cst_1 = arith.constant 0.000000e+00 : f32
    %cst_2 = arith.constant 6.000000e+00 : f32
    %3 = vector.broadcast %cst_1 : f32 to vector<2x1024xf32>
    %4 = arith.maximumf %3, %2 : vector<2x1024xf32>
    %5 = vector.broadcast %cst_2 : f32 to vector<2x1024xf32>
    %6 = arith.minimumf %5, %4 : vector<2x1024xf32>
    %cst_3 = arith.constant 6.000000e+00 : f32
    %7 = vector.broadcast %cst_3 : f32 to vector<2x1024xf32>
    %8 = arith.divf %6, %7 : vector<2x1024xf32>
    %c0_4 = arith.constant 0 : index
    %c0_5 = arith.constant 0 : index
    %9 = vector.load %arg2[%c0_4, %c0_5] : memref<2x1024xf32, #tpu.memory_space<vmem>>, vector<2x1024xf32>
    tpu.vector_store %arg2[%c0_4, %c0_5], %8 {strides = array<i32>} : memref<2x1024xf32, #tpu.memory_space<vmem>>, vector<2x1024xf32>,
    return
  }
  func.func @transform_0(%arg0: i32) -> (i32, i32) {
    %c0_i32 = arith.constant 0 : i32
    %c0_i32_0 = arith.constant 0 : i32
    return %arg0, %c0_i32 : i32, i32
  }
  func.func @transform_1(%arg0: i32) -> (i32, i32) {
    %c0_i32 = arith.constant 0 : i32
    %c0_i32_0 = arith.constant 0 : i32
    return %arg0, %c0_i32 : i32, i32
  }
}

</mosaic_0001>

<bundles_post_ra>
// kernel: tpu_custom_call.1
= control target key start
LH: loop header
LB: loop body
LE: loop exit
PB: predicated region body
PF: predicated region fallthrough
CT: control target
= control target key end

     0   :  { %6 = vsyncpa [#allocation3], 0  ;;  %s113_s0 = inlined_call_operand.hbm [shape: f32[2,1024], index: 0, kind: input, shape index: {}]   ;;  %s114_s1 = inlined_call_operand.hbm [shape: f32[2,1024], index: 1, kind: output, shape index: {}]  }
   0x1   :  { %7 = vsyncpa [#allocation4], 0  ;;  %s95_s6 = smov [#allocation2]  }
   0x2   :  { %s14_s7 = sshll.u32 %s95_s6, 4  ;;  %s15_s7 = int_to_ptr.vmem [resolvable:$true] %s14_s7 }
   0x3   :  { %s59_s8 = scalar_lea.vmem %s15_s7, 256  ;;  %p64_p1 = scmp.lt.s32.totalorder %s15_s7, %s15_s7 }
   0x4   :  { %p60_p0 = scmp.ne.s32.totalorder %s15_s7, %s59_s8  ;;  %p65_p2 = scmp.lt.s32.totalorder %s59_s8, %s59_s8 }
   0x6   :  { %p66_p3 = por %p65_p2, %p64_p1 }
   0x8   :  { %p67_p4 = pnand %p66_p3, %p60_p0 }
   0xa   :  { %70 = shalt.err (!%p67_p4)
}
   0xb   :  { %17 = dma.hbm_to_vmem [thread:$0]  %s113_s0, 256, %s15_s7, [#allocation3]  }
   0xc   :  { %91 = dma.done.wait [#allocation3], 256  }
   0xd   :  { %92 = vsyncadd [#allocation3], 4294967040  ;;  %v21_v0 = vld [vmem:[#allocation2] sm:$0xff]  ;;  %v22_v1 = vld [vmem:[#allocation2 + $0x8] sm:$0xff]  ;;  %s96_s11 = smov [#allocation5]  }
   0xe   :  { %v23_v2 = vadd.f32 3.0, %v21_v0  ;;  %v24_v3 = vadd.f32 3.0, %v22_v1  ;;  %s40_s12 = sshll.u32 %s96_s11, 4  ;;  %s41_s12 = int_to_ptr.vmem [resolvable:$true] %s40_s12 }
   0xf   :  { %s71_s13 = scalar_lea.vmem %s41_s12, 256  ;;  %p76_p6 = scmp.lt.s32.totalorder %s41_s12, %s41_s12 }
  0x10   :  { %v25_v4 = vmax.f32 %v23_v2, 0.0  ;;  %v26_v5 = vmax.f32 %v24_v3, 0.0  ;;  %p72_p5 = scmp.ne.s32.totalorder %s41_s12, %s71_s13  ;;  %p77_p7 = scmp.lt.s32.totalorder %s71_s13, %s71_s13 }
  0x12   :  { %v27_v6 = vmin.f32 %v25_v4, 6.0  ;;  %v28_v7 = vmin.f32 %v26_v5, 6.0  ;;  %p78_p8 = por %p77_p7, %p76_p6 }
  0x14   :  { %v30_v8 = vmul.f32 0.16666667, %v27_v6  ;;  %v31_v9 = vmul.f32 0.16666667, %v28_v7  ;;  %p79_p9 = pnand %p78_p8, %p72_p5 }
  0x16   :  { %32 = vst [vmem:[#allocation5] sm:$0xff] %v30_v8  ;;  %33 = vst [vmem:[#allocation5 + $0x8] sm:$0xff] %v31_v9 }
  0x17   :  { %82 = shalt.err (!%p79_p9)
}
  0x18   :  { %43 = dma.vmem_to_hbm [thread:$0]  %s41_s12, 256, %s114_s1, [#allocation4]  }
  0x19   :  { %93 = dma.done.wait [#allocation4], 256  }
  0x1a   :  { %94 = vsyncadd [#allocation4], 4294967040 }
  0x1b   :  { %47 = vsyncpa [#allocation3], 1 }
  0x1c   :  { %48 = vsyncpa [#allocation4], 1 }

</bundles_post_ra>
